<compile_context>
chip_gen: v6e
topology: v6e:2x2x1
jax: 0.10.0
libtpu: 0.0.40
codegen_flags: <defaults>
</compile_context>

<pallas_src>
import functools

import jax
import jax.numpy as jnp
from jax.experimental import pallas as pl
from jax.experimental.pallas import tpu as pltpu

_LANE = 128
_SUBLANE = 8


def _round_up(a, m):
    return (a + m - 1) // m * m


def _vmem_capacity_bytes():
    """Physical VMEM per core; conservative 64 MiB (v7x) fallback."""
    try:
        info = pltpu.get_tpu_info()
        cap = getattr(info, "vmem_capacity_bytes", None)
        if cap:
            return int(cap)
    except Exception:
        pass
    return 64 * 1024 * 1024


# ---------------------------------------------------------------------------
# Kernel 1: whole-graph path (small / medium V).  bt graphs folded per step.
# ---------------------------------------------------------------------------
def _gcn_kernel_full(x_ref, g_ref, dg_ref, wt_ref, b_ref, o_ref):
    x = x_ref[...]          # (bt, Vp, H)
    g = g_ref[...]          # (bt, Vp, Vp)
    dg = dg_ref[...]        # (bt, Vp, 1)   diag(G), precomputed in wrapper
    wt = wt_ref[...]        # (H, Hp)       W^T, output dim zero-padded to Hp
    b = b_ref[...]          # (1, Hp)

    bt, Vp, H = x.shape
    Hp = wt.shape[1]

    # Linear layer: one dense MXU matmul over all folded graphs (Vp % 8 == 0,
    # so the flatten is layout-compatible and does not materialize a copy).
    xp = jnp.dot(x.reshape(bt * Vp, H), wt,
                 preferred_element_type=jnp.float32) + b
    xp = xp.reshape(bt, Vp, Hp)

    # Row degrees n = rowsum(G): XLU reduce on data already resident in VMEM.
    n = jnp.sum(g, axis=-1, keepdims=True)                       # (bt, Vp, 1)

    # Message passing without materializing G':  G'@xp = G@xp + n*xp
    out = jnp.einsum('bjk,bkl->bjl', g, xp,
                     preferred_element_type=jnp.float32) + n * xp

    # Mean reduce: divide by diag(G') = diag(G) + n, zeros replaced with 1.
    d = dg + n
    d = jnp.where(d == 0.0, 1.0, d)
    out = out * pl.reciprocal(d, approx=False)

    # Final ReLU (no extra layers / norms in default config).
    o_ref[...] = jnp.maximum(out, 0.0).astype(o_ref.dtype)


# ---------------------------------------------------------------------------
# Kernel 2: row-tiled path (large V).  Grid = (batch, V-row-tiles); xp is
# computed once per graph into a resident VMEM scratch under pl.when(j==0).
# ---------------------------------------------------------------------------
def _gcn_kernel_vtiled(x_ref, g_ref, dg_ref, wt_ref, b_ref, o_ref, xp_ref, *, tv):
    j = pl.program_id(1)

    @pl.when(j == 0)
    def _():
        # Linear for the whole graph, once per batch element.
        xp_ref[...] = (jnp.dot(x_ref[0], wt_ref[...],
                               preferred_element_type=jnp.float32) + b_ref[...])

    g = g_ref[0]            # (tv, Vp)   row tile of G, full contraction dim
    dg = dg_ref[0]          # (tv, 1)

    n = jnp.sum(g, axis=-1, keepdims=True)                        # (tv, 1)

    row0 = pl.multiple_of(j * tv, tv)
    xp_rows = xp_ref[pl.ds(row0, tv), :]                          # (tv, Hp)

    out = (jnp.dot(g, xp_ref[...], preferred_element_type=jnp.float32)
           + n * xp_rows)

    d = dg + n
    d = jnp.where(d == 0.0, 1.0, d)
    out = out * pl.reciprocal(d, approx=False)

    o_ref[0] = jnp.maximum(out, 0.0).astype(o_ref.dtype)


# ---------------------------------------------------------------------------
# Tile sizing (byte-budgeted, per review)
# ---------------------------------------------------------------------------
def _choose_bt(B, Vp, H, Hp, budget):
    """Largest bt whose double-buffered blocks + f32 temps fit the budget.
    Returns 0 if even a single whole graph does not fit (use row-tiled path)."""
    per_graph = (2 * (Vp * Vp + Vp * H + Vp + Vp * Hp)   # dbl-buffered G,x,dg,out
                 + 3 * Vp * Hp) * 4                        # xp/out f32 temporaries
    resident = (H * Hp + Hp) * 4                           # W^T + bias
    avail = budget - resident
    if avail < per_graph:
        return 0
    bt = min(B, avail // per_graph)
    if B >= 2:
        # Keep at least 2 grid steps so the "parallel" batch axis can actually
        # shard across 2 TensorCores (v7x) instead of stranding one.
        bt = min(bt, -(-B // 2))
    return max(1, int(bt))


def _choose_tv(Vp, H, Hp, budget, v_tile):
    """Row-tile height for the large-V path (multiple of 8)."""
    if v_tile is not None:
        return max(_SUBLANE, _round_up(int(v_tile), _SUBLANE))
    fixed = (H * Hp + Hp + 2 * Vp * H + Vp * Hp) * 4       # W^T, b, x block, xp scratch
    per_row = (2 * (Vp + 1 + Hp) + 3 * Hp) * 4             # dbl-buffered G/dg/out rows + temps
    tv = (budget - fixed) // per_row
    tv = max(_SUBLANE, (int(tv) // _SUBLANE) * _SUBLANE)
    return min(tv, Vp)


# ---------------------------------------------------------------------------
# Wrapper
# ---------------------------------------------------------------------------
def gcn_layer(x, G, W, b, *, v_tile=None):
    """x: (B, V, H) float32, G: (B, V, V) float32, W: (H, H), b: (H,).

    v_tile: optional forced row-tile height (multiple of 8) to exercise the
    large-V path; normally chosen automatically from the VMEM budget.
    """
    B, V, H = x.shape

    Hp = _round_up(H, _LANE)       # lane-dense Linear output / kernel output
    Vp = _round_up(V, _SUBLANE)    # sublane-aligned vertex count

    vmem_cap = _vmem_capacity_bytes()
    budget = int(0.70 * vmem_cap)          # working-set budget (blocks + temps)
    vmem_limit = int(0.90 * vmem_cap)      # scoped VMEM limit handed to Mosaic

    bt = _choose_bt(B, Vp, H, Hp, budget)
    use_vtiled = (v_tile is not None) or (bt == 0)

    tv = None
    if use_vtiled:
        tv = _choose_tv(Vp, H, Hp, budget, v_tile)
        tv = min(tv, _round_up(V, _SUBLANE))
        Vp = _round_up(V, tv)              # make the row tile divide padded V

    # One-time wrapper-side prep (loop-invariant / tiny). Zero padding of G/x
    # rows-cols and of the Linear output dim is algebraically inert here
    # (padded rows end up as relu(0)=0, padded output columns are 0) and is
    # sliced off below.
    Wt = jnp.pad(W.T, ((0, 0), (0, Hp - H)))                  # (H, Hp)
    b2 = jnp.pad(b, (0, Hp - H)).reshape(1, Hp)               # (1, Hp)
    x_p = jnp.pad(x, ((0, 0), (0, Vp - V), (0, 0)))           # (B, Vp, H)
    G_p = jnp.pad(G, ((0, 0), (0, Vp - V), (0, Vp - V)))      # (B, Vp, Vp)
    dg = jnp.diagonal(G_p, axis1=-2, axis2=-1)[..., None]     # (B, Vp, 1)

    if not use_vtiled:
        # -------- whole-graph path, bt graphs per grid step --------
        Bp = _round_up(B, bt)
        if Bp != B:   # ragged batch (e.g. prime B): pad with empty graphs
            x_p = jnp.pad(x_p, ((0, Bp - B), (0, 0), (0, 0)))
            G_p = jnp.pad(G_p, ((0, Bp - B), (0, 0), (0, 0)))
            dg = jnp.pad(dg, ((0, Bp - B), (0, 0), (0, 0)))

        out = pl.pallas_call(
            _gcn_kernel_full,
            out_shape=jax.ShapeDtypeStruct((Bp, Vp, Hp), x.dtype),
            grid_spec=pltpu.PrefetchScalarGridSpec(
                num_scalar_prefetch=0,
                grid=(Bp // bt,),
                in_specs=[
                    pl.BlockSpec((bt, Vp, H), lambda i: (i, 0, 0)),    # x
                    pl.BlockSpec((bt, Vp, Vp), lambda i: (i, 0, 0)),   # G
                    pl.BlockSpec((bt, Vp, 1), lambda i: (i, 0, 0)),    # diag(G)
                    pl.BlockSpec((H, Hp), lambda i: (0, 0)),           # W^T (resident)
                    pl.BlockSpec((1, Hp), lambda i: (0, 0)),           # bias (resident)
                ],
                out_specs=pl.BlockSpec((bt, Vp, Hp), lambda i: (i, 0, 0)),
            ),
            compiler_params=pltpu.CompilerParams(
                dimension_semantics=("parallel",),
                vmem_limit_bytes=vmem_limit),
        )(x_p, G_p, dg, Wt, b2)
        return out[:B, :V, :H]

    # -------- row-tiled path over V (large V / forced) --------
    nj = Vp // tv
    kernel = functools.partial(_gcn_kernel_vtiled, tv=tv)
    out = pl.pallas_call(
        kernel,
        out_shape=jax.ShapeDtypeStruct((B, Vp, Hp), x.dtype),
        grid_spec=pltpu.PrefetchScalarGridSpec(
            num_scalar_prefetch=0,
            grid=(B, nj),
            in_specs=[
                pl.BlockSpec((1, Vp, H), lambda bi, j: (bi, 0, 0)),    # x (resident per graph)
                pl.BlockSpec((1, tv, Vp), lambda bi, j: (bi, j, 0)),   # G row tile
                pl.BlockSpec((1, tv, 1), lambda bi, j: (bi, j, 0)),    # diag(G) row tile
                pl.BlockSpec((H, Hp), lambda bi, j: (0, 0)),           # W^T (resident)
                pl.BlockSpec((1, Hp), lambda bi, j: (0, 0)),           # bias (resident)
            ],
            out_specs=pl.BlockSpec((1, tv, Hp), lambda bi, j: (bi, j, 0)),
            scratch_shapes=[pltpu.VMEM((Vp, Hp), jnp.float32)],        # xp, per graph
        ),
        compiler_params=pltpu.CompilerParams(
            dimension_semantics=("parallel", "arbitrary"),
            vmem_limit_bytes=vmem_limit),
    )(x_p, G_p, dg, Wt, b2)
    return out[:B, :V, :H]


def gcn_layer_ref(x, G, W, b):
    """Pure-JAX reference mirroring the PyTorch forward."""
    xp = jnp.einsum("bvh,oh->bvo", x, W) + b
    n = jnp.sum(G, axis=2)
    eye = jnp.eye(G.shape[1], dtype=G.dtype)
    Gp = G + jnp.einsum("bj,jk->bjk", n, eye)
    out = jnp.einsum("bjk,bkl->bjl", Gp, xp)
    diag = jnp.diagonal(Gp, axis1=-2, axis2=-1)
    diag = jnp.where(diag == 0.0, 1.0, diag)
    out = out / diag[:, :, None]
    return jnp.maximum(out, 0.0)


if __name__ == "__main__":
    def make_inputs(key, B, V, H):
        kx, kg, kw, kb = jax.random.split(key, 4)
        x = jax.random.normal(kx, (B, V, H), dtype=jnp.float32)
        # Deterministic symmetric 0/1 adjacency, zero diagonal.
        g_raw = (jax.random.uniform(kg, (B, V, V)) > 0.5).astype(jnp.float32)
        G = jnp.triu(g_raw, k=1)
        G = G + jnp.swapaxes(G, -1, -2)
        # Deterministic Linear params (nn.Linear(hidden, hidden): W (H,H), b (H,)).
        bound = 1.0 / jnp.sqrt(H)
        W = jax.random.uniform(kw, (H, H), minval=-bound, maxval=bound,
                               dtype=jnp.float32)
        b = jax.random.uniform(kb, (H,), minval=-bound, maxval=bound,
                               dtype=jnp.float32)
        return x, G, W, b

    # Default (auto-sized, whole-graph) path: B=2 graphs, V=8 vertices, H=32.
    x, G, W, bias = make_inputs(jax.random.PRNGKey(0), 2, 8, 32)
    out = jax.block_until_ready(gcn_layer(x, G, W, bias))
    ref = gcn_layer_ref(x, G, W, bias)
    assert out.shape == ref.shape
    assert jnp.allclose(out, ref, atol=1e-5, rtol=1e-5), "mismatch (full path)"

    # Row-tiled (large-V) path, forced at a small shape to verify correctness.
    x2, G2, W2, b2 = make_inputs(jax.random.PRNGKey(1), 2, 16, 32)
    out2 = jax.block_until_ready(gcn_layer(x2, G2, W2, b2, v_tile=8))
    ref2 = gcn_layer_ref(x2, G2, W2, b2)
    assert out2.shape == ref2.shape
    assert jnp.allclose(out2, ref2, atol=1e-5, rtol=1e-5), "mismatch (tiled path)"

    print("KERNEL_OK")
</pallas_src>

<mosaic_0001>
module attributes {stable_mosaic.version = 11 : i64} {
  func.func @_gcn_kernel_full(%arg0: i32, %arg1: memref<1x8x32xf32, #tpu.memory_space<vmem>>, %arg2: memref<1x8x8xf32, #tpu.memory_space<vmem>>, %arg3: memref<1x8x1xf32, #tpu.memory_space<vmem>>, %arg4: memref<32x128xf32, #tpu.memory_space<vmem>>, %arg5: memref<1x128xf32, #tpu.memory_space<vmem>>, %arg6: memref<1x8x128xf32, #tpu.memory_space<vmem>>) attributes {dimension_semantics = [#tpu.dimension_semantics<parallel>], iteration_bounds = array<i64: 2>, scalar_prefetch = 0 : i64, scratch_operands = 0 : i64, tpu.core_type = #tpu.core_type<tc>, window_params = [{transform_indices = @transform_0, window_bounds = array<i64: 1, 8, 32>}, {transform_indices = @transform_1, window_bounds = array<i64: 1, 8, 8>}, {transform_indices = @transform_2, window_bounds = array<i64: 1, 8, 1>}, {pipeline_mode = #tpu.pipeline_mode<synchronous>, transform_indices = @transform_3, window_bounds = array<i64: 32, 128>}, {pipeline_mode = #tpu.pipeline_mode<synchronous>, transform_indices = @transform_4, window_bounds = array<i64: 1, 128>}, {transform_indices = @transform_5, window_bounds = array<i64: 1, 8, 128>}]} {
    %c0 = arith.constant 0 : index
    %c0_0 = arith.constant 0 : index
    %c0_1 = arith.constant 0 : index
    %0 = vector.load %arg1[%c0, %c0_0, %c0_1] : memref<1x8x32xf32, #tpu.memory_space<vmem>>, vector<1x8x32xf32>
    %c0_2 = arith.constant 0 : index
    %c0_3 = arith.constant 0 : index
    %c0_4 = arith.constant 0 : index
    %1 = vector.load %arg2[%c0_2, %c0_3, %c0_4] : memref<1x8x8xf32, #tpu.memory_space<vmem>>, vector<1x8x8xf32>
    %c0_5 = arith.constant 0 : index
    %c0_6 = arith.constant 0 : index
    %c0_7 = arith.constant 0 : index
    %2 = vector.load %arg3[%c0_5, %c0_6, %c0_7] : memref<1x8x1xf32, #tpu.memory_space<vmem>>, vector<1x8x1xf32>
    %c0_8 = arith.constant 0 : index
    %c0_9 = arith.constant 0 : index
    %3 = vector.load %arg4[%c0_8, %c0_9] : memref<32x128xf32, #tpu.memory_space<vmem>>, vector<32x128xf32>
    %c0_10 = arith.constant 0 : index
    %c0_11 = arith.constant 0 : index
    %4 = vector.load %arg5[%c0_10, %c0_11] : memref<1x128xf32, #tpu.memory_space<vmem>>, vector<1x128xf32>
    %5 = vector.shape_cast %0 : vector<1x8x32xf32> to vector<8x32xf32>
    %cst = arith.constant dense<0.000000e+00> : vector<8x128xf32>
    %6 = tpu.matmul %5, %3, %cst {dimension_numbers = #tpu.dot_dimension_numbers<[1], [0], [0], [1], [0, 0, 1, 1], [], []>} : vector<8x32xf32>, vector<32x128xf32>, vector<8x128xf32> -> vector<8x128xf32>
    %7 = vector.broadcast %4 : vector<1x128xf32> to vector<8x128xf32>
    %8 = arith.addf %6, %7 : vector<8x128xf32>
    %9 = vector.shape_cast %8 : vector<8x128xf32> to vector<1x8x128xf32>
    %cst_12 = arith.constant dense<0.000000e+00> : vector<1x8xf32>
    %10 = vector.multi_reduction <add>, %1, %cst_12 [2] : vector<1x8x8xf32> to vector<1x8xf32>
    %11 = vector.shape_cast %10 : vector<1x8xf32> to vector<1x8x1xf32>
    "tpu.trace_start"() <{level = 10 : i32, message = "bjk,bkl->bjl"}> : () -> ()
    %cst_13 = arith.constant dense<0.000000e+00> : vector<1x8x128xf32>
    %12 = tpu.matmul %1, %9, %cst_13 {dimension_numbers = #tpu.dot_dimension_numbers<[2], [1], [1], [2], [0, 0, 0, 1, 1, 2], [0], [0]>} : vector<1x8x8xf32>, vector<1x8x128xf32>, vector<1x8x128xf32> -> vector<1x8x128xf32>
    "tpu.trace_stop"() : () -> ()
    %13 = vector.broadcast %11 : vector<1x8x1xf32> to vector<1x8x128xf32>
    %14 = arith.mulf %13, %9 : vector<1x8x128xf32>
    %15 = arith.addf %12, %14 : vector<1x8x128xf32>
    %16 = arith.addf %2, %11 : vector<1x8x1xf32>
    %cst_14 = arith.constant 0.000000e+00 : f32
    %17 = vector.broadcast %cst_14 : f32 to vector<1x8x1xf32>
    %18 = arith.cmpf oeq, %16, %17 : vector<1x8x1xf32>
    %cst_15 = arith.constant 1.000000e+00 : f32
    %19 = vector.broadcast %cst_15 : f32 to vector<1x8x1xf32>
    %20 = arith.select %18, %19, %16 : vector<1x8x1xi1>, vector<1x8x1xf32>
    %21 = tpu.reciprocal %20 : vector<1x8x1xf32> -> vector<1x8x1xf32>
    %22 = vector.broadcast %21 : vector<1x8x1xf32> to vector<1x8x128xf32>
    %23 = arith.mulf %15, %22 : vector<1x8x128xf32>
    %cst_16 = arith.constant 0.000000e+00 : f32
    %24 = vector.broadcast %cst_16 : f32 to vector<1x8x128xf32>
    %25 = arith.maximumf %23, %24 : vector<1x8x128xf32>
    %c0_17 = arith.constant 0 : index
    %c0_18 = arith.constant 0 : index
    %c0_19 = arith.constant 0 : index
    %26 = vector.load %arg6[%c0_17, %c0_18, %c0_19] : memref<1x8x128xf32, #tpu.memory_space<vmem>>, vector<1x8x128xf32>
    tpu.vector_store %arg6[%c0_17, %c0_18, %c0_19], %25 {strides = array<i32>} : memref<1x8x128xf32, #tpu.memory_space<vmem>>, vector<1x8x128xf32>,
    return
  }
  func.func @transform_0(%arg0: i32) -> (i32, i32, i32) {
    %c0_i32 = arith.constant 0 : i32
    %c0_i32_0 = arith.constant 0 : i32
    %c0_i32_1 = arith.constant 0 : i32
    return %arg0, %c0_i32, %c0_i32_0 : i32, i32, i32
  }
  func.func @transform_1(%arg0: i32) -> (i32, i32, i32) {
    %c0_i32 = arith.constant 0 : i32
    %c0_i32_0 = arith.constant 0 : i32
    %c0_i32_1 = arith.constant 0 : i32
    return %arg0, %c0_i32, %c0_i32_0 : i32, i32, i32
  }
  func.func @transform_2(%arg0: i32) -> (i32, i32, i32) {
    %c0_i32 = arith.constant 0 : i32
    %c0_i32_0 = arith.constant 0 : i32
    %c0_i32_1 = arith.constant 0 : i32
    return %arg0, %c0_i32, %c0_i32_0 : i32, i32, i32
  }
  func.func @transform_3(%arg0: i32) -> (i32, i32) {
    %c0_i32 = arith.constant 0 : i32
    %c0_i32_0 = arith.constant 0 : i32
    %c0_i32_1 = arith.constant 0 : i32
    return %c0_i32, %c0_i32_0 : i32, i32
  }
  func.func @transform_4(%arg0: i32) -> (i32, i32) {
    %c0_i32 = arith.constant 0 : i32
    %c0_i32_0 = arith.constant 0 : i32
    %c0_i32_1 = arith.constant 0 : i32
    return %c0_i32, %c0_i32_0 : i32, i32
  }
  func.func @transform_5(%arg0: i32) -> (i32, i32, i32) {
    %c0_i32 = arith.constant 0 : i32
    %c0_i32_0 = arith.constant 0 : i32
    %c0_i32_1 = arith.constant 0 : i32
    return %arg0, %c0_i32, %c0_i32_0 : i32, i32, i32
  }
}

</mosaic_0001>

<bundles_post_ra>
// kernel: tpu_custom_call.1
= control target key start
LH: loop header
LB: loop body
LE: loop exit
PB: predicated region body
PF: predicated region fallthrough
CT: control target
= control target key end

     0   :  { %10 = vsyncpa [#allocation3], 0  ;;  %s1025_s0 = inlined_call_operand.vmem [shape: f32[2,8,32], index: 0, kind: input, shape index: {}]   ;;  %s1026_s1 = inlined_call_operand.hbm [shape: f32[2,8,8], index: 1, kind: input, shape index: {}]   ;;  %s1027_s2 = inlined_call_operand.vmem [shape: f32[2,8,1], index: 2, kind: input, shape index: {}]   ;;  %s1028_s3 = inlined_call_operand.hbm [shape: f32[32,128], index: 3, kind: input, shape index: {}]   ;;  %s1029_s4 = inlined_call_operand.vmem [shape: f32[1,128], index: 4, kind: input, shape index: {}]   ;;  %s1030_s5 = inlined_call_operand.hbm [shape: f32[2,8,128], index: 5, kind: output, shape index: {}]  }
   0x1   :  { %12 = vsyncpa [#allocation3 + $0x1], 0 }
   0x2   :  { %13 = vsyncpa [#allocation6], 0 }
   0x3   :  { %14 = vsyncpa [#allocation4], 0 }
   0x4   :  { %16 = vsyncpa [#allocation4 + $0x1], 0  ;;  %s854_s18 = smov 0   ;;  %s856_s19 = smov 0  }
   0x5   :  { %s858_s20 = smov 0   ;;  %s860_s21 = smov 0  }
   0x6 LB: > { %s875_s22 = sadd.s32 4294967295, %s814_s21   ;;  %s585_s23 = sadd.s32 4294967294, %s814_s21   ;;  %s814_s21 = sphi %s860_s21, %s1052_s21   ;;  %s810_s20 = sphi %s858_s20, %s1051_s20   ;;  %s806_s19 = sphi %s856_s19, %s1050_s19   ;;  %s802_s18 = sphi %s854_s18, %s1049_s18  }
   0x7   : > { %p68_p0 = scmp.ne.s32.totalorder %s806_s19, %s802_s18  ;;  %p1031_p1 = scmp.eq.s32.totalorder %s875_s22, 0 }
   0x8   : > { %p166_p3 = scmp.eq.s32.totalorder %s585_s23, 1  ;;  %p586_p5 = scmp.ge.s32.totalorder %s814_s21, 1 }
   0x9   : > { %p884_p4 = por %p1031_p1, %p68_p0  ;;  %p173_p7 = scmp.lt.s32.totalorder %s814_s21, 3 }
   0xa   : > { %p889_p6 = por %p166_p3, %p68_p0  ;;  %s816_s27 = smov [#allocation5]  }
   0xb   : > { %s1035_s24 = scalar_select %p884_p4, 1, 0 }
   0xc   : > { %s1036_s25 = scalar_select %p889_p6, 1, 0 }
   0xd   : > { %p894_p8 = pnand %p586_p5, %p173_p7  ;;  %s185_s28 = sshll.u32 %s816_s27, 4  ;;  %s186_s28 = int_to_ptr.vmem [resolvable:$true] %s185_s28 }
   0xe   : > { %s908_s30 = sadd.s32 1, %s814_s21   ;;  %s55_s6 = sadd.s32 1, %s810_s20 }
   0xf   : > { %s1037_s26 = scalar_select %p894_p8, 1, 0 }
  0x10   : > { %p635_p9 = pneg %p894_p8  ;;  %s52_s7 = ssub.s32 %s814_s21, %s908_s30 }
  0x11   : > { %s703_s8 = scalar_lea.vmem %s186_s28, 512  ;;  %p711_p5 = scmp.lt.s32.totalorder %s186_s28, %s186_s28 }
  0x12   : > { %p903_p11 = pnand %p635_p9, %p1031_p1  ;;  %p704_p13 = scmp.ne.s32.totalorder %s186_s28, %s703_s8 }
  0x13   : > { %p712_p7 = scmp.lt.s32.totalorder %s703_s8, %s703_s8 }
  0x14   : > { %p694_p12 = pneg %p903_p11 }
  0x15   : > { %p713_p10 = por %p712_p7, %p711_p5 }
  0x16   : > { %p706_p0 = pnand %p704_p13, %p694_p12 }
  0x18   : > { %p707_p3 = pneg %p706_p0 }
  0x1a   : > { %p714_p2 = pnand %p713_p10, %p707_p3 }
  0x1c   : > { %717 = shalt.err (!%p714_p2)
}
  0x1d   : > { %s817_s9 = smov 128   ;;  %s818_s10 = smov 8  }
  0x1e   : > { %638 = dma.hbm_to_vmem [thread:$0]  (!%p903_p11), %s1028_s3, 512, %s186_s28, [#allocation6], %s817_s9, %s817_s9, %s818_s10  }
  0x1f   : > { %p53_p9 = scmp.eq.s32.totalorder %s52_s7, 0  ;;  %p62_p12 = scmp.ne.s32.totalorder %s810_s20, %s806_s19 }
  0x20   : > { %p63_p10 = scmp.eq.s32.totalorder %s814_s21, 0  ;;  %p648_p2 = scmp.lt.s32.totalorder %s814_s21, 2 }
  0x21   : > { %s925_s13 = scalar_select %p53_p9, %s810_s20, %s55_s6  }
  0x22   : > { %p64_p13 = por %p63_p10, %p62_p12  ;;  %p1039_p0 = scmp.eq.s32.totalorder %s875_s22, 1 }
  0x23   : > { %s209_s15 = sand.u32 1, %s810_s20   ;;  %s590_s16 = sshll.u32 %s814_s21, 7 }
  0x24   : > { %p929_p3 = por %p1039_p0, %p62_p12  ;;  %s589_s17 = sshll.u32 %s209_s15, 3 }
  0x25   : > { %s938_s29 = scalar_lea.hbm %s1026_s1, %s590_s16  ;;  %s213_s28 = scalar_lea.vmem [#allocation2], %s589_s17 }
  0x26   : > { %s1040_s14 = scalar_select %p929_p3, 1, 0 }
  0x27   : > { %s220_s6 = sshll.u32 %s213_s28, 4  ;;  %p940_p11 = pnand %p648_p2, %p64_p13  ;;  %s221_s6 = int_to_ptr.vmem [resolvable:$true] %s220_s6 }
  0x28   : > { %s210_s8 = scalar_lea.sflag [#allocation3], %s209_s15  ;;  %s718_s9 = scalar_lea.hbm %s938_s29, 128 }
  0x29   : > { %p719_p5 = scmp.ne.s32.totalorder %s938_s29, %s718_s9  ;;  %p720_p7 = pneg %p940_p11 }
  0x2a   : > { %s723_s12 = scalar_lea.hbm %s1026_s1, 256  ;;  %p724_p10 = scmp.lt.s32.totalorder %s938_s29, %s1026_s1 }
  0x2b   : > { %p721_p9 = pnand %p720_p7, %p719_p5  ;;  %p725_p2 = scmp.lt.s32.totalorder %s723_s12, %s718_s9 }
  0x2d   : > { %p722_p12 = pneg %p721_p9  ;;  %p726_p13 = por %p725_p2, %p724_p10 }
  0x2f   : > { %p727_p0 = pnand %p726_p13, %p722_p12 }
  0x31   : > { %730 = shalt.err (!%p727_p0)
}
  0x32   : > { %s731_s23 = scalar_lea.vmem %s221_s6, 128  ;;  %s819_s15 = smov [#allocation2]  }
  0x33   : > { %p732_p1 = scmp.ne.s32.totalorder %s221_s6, %s731_s23  ;;  %s736_s27 = sshll.u32 %s819_s15, 4  ;;  %s737_s27 = int_to_ptr.vmem [resolvable:$false] %s736_s27 }
  0x34   : > { %s738_s28 = scalar_lea.vmem %s737_s27, 256  ;;  %p739_p5 = scmp.lt.s32.totalorder %s221_s6, %s737_s27 }
  0x35   : > { %p734_p6 = pnand %p732_p1, %p720_p7  ;;  %p740_p9 = scmp.lt.s32.totalorder %s738_s28, %s731_s23 }
  0x37   : > { %p735_p3 = pneg %p734_p6  ;;  %p741_p4 = por %p740_p9, %p739_p5 }
  0x39   : > { %p742_p8 = pnand %p741_p4, %p735_p3 }
  0x3b   : > { %745 = shalt.err (!%p742_p8)
}
  0x3c   : > { %642 = dma.hbm_to_vmem [thread:$0]  (!%p940_p11), %s938_s29, 128, %s221_s6, %s210_s8  }
  0x3d   : > { %p1042_p12 = scmp.ne.s32.totalorder %s1037_s26, 0 }
  0x3e   : > { %s961_s9 = sand.u32 (!%p1042_p12), 1, %s806_s19   ;;  %p1043_p1 = scmp.ne.s32.totalorder (!%p1042_p12), %s1035_s24, 0 }
  0x3f   : > { %236 = sbr.rel (%p1042_p12) target bundleno = 490 (0x1ea), region = 40  ;;  %s592_s10 = sshll.u32 (!%p1042_p12), %s961_s9, 3 }
  0x40   : > { %s239_s11 = scalar_lea.sflag (!%p1042_p12), [#allocation3], %s961_s9  ;;  %s242_s12 = scalar_lea.vmem (!%p1042_p12), [#allocation2], %s592_s10 }
  0x44   : > { %789 = dma.done.wait (%p1043_p1), %s239_s11, 128  }
  0x45   : > { %791 = vsyncadd (%p1043_p1), %s239_s11, 4294967168  ;;  %p1044_p4 = scmp.eq.s32.totalorder %s875_s22, 0 }
  0x47   : > { %793 = dma.done.wait (%p1044_p4), [#allocation6], 512   ;;  %p1045_p6 = pmov %p1044_p4 }
  0x48   : > { %p281_p8 = scmp.lt.s32.totalorder %s875_s22, 1  ;;  %v820_v0 = vmov 0.0   ;;  %vm821_vm0 = vmmov 0   ;;  %vm377_vm1 = vcmask 64512   ;;  %v295_v1 = vld [vmem:[#allocation5 + $0x18] sm:$0xff]  ;;  %v294_v2 = vld [vmem:[#allocation5 + $0x10] sm:$0xff] }
  0x49   : > { %795 = vsyncadd (%p1045_p6), [#allocation6], 4294966784  ;;  %611 = vmatprep.subr.mxu0 %v820_v0  ;;  %619 = vmatprep.mubr.msk.f32.mxu0 %vm821_vm0, %v820_v0  ;;  %v290_v3 = vld [vmem:[%s242_s12] sm:$0xff]  ;;  %v293_v4 = vld [vmem:[#allocation5 + $0x8] sm:$0xff]  ;;  %vm303_vm2 = vcmask 261120   ;;  %v822_v8 = vmov 0  }
  0x4a   : > { %s282_s26 = scalar_select %p281_p8, %s875_s22, 1  ;;  %622 = vmatprep.subr.mxu1 %v820_v0  ;;  %624 = vmatprep.mubr.msk.f32.mxu1 %vm821_vm0, %v820_v0  ;;  %v378_v5 = vsel %vm377_vm1, %v290_v3, 0.0  ;;  %v292_v6 = vld [vmem:[#allocation5] sm:$0xff]  ;;  %v597_v14 = vld [vmem:[%s1029_s4] ss:$0 sm:$0xff] }
  0x4b   : > { %612 = vmatpush3.msra.mxu0 %v295_v1  ;;  %379 = vadd.xlane.f32.xlu0 %v378_v5  ;;  %s601_s27 = sshll.u32 %s875_s22, 7  ;;  %s280_s28 = scalar_lea.vmem [#allocation7], %s592_s10 }
  0x4c   : > { %s595_s29 = sshll.u32 %s282_s26, 3  ;;  %613 = vmatprep.subr.mxu0 %v820_v0  ;;  %689 = vset.pattern.permute.xlu0 %v822_v8  ;;  %s481_s11 = sshll.u32 %s280_s28, 4  ;;  %s482_s11 = int_to_ptr.vmem [resolvable:$true] %s481_s11 }
  0x4d   : > { %s284_s7 = scalar_lea.vmem %s1025_s0, %s595_s29  ;;  %614 = vmatpush3.msra.mxu0 %v294_v2  ;;  %s288_s17 = scalar_lea.vmem %s1027_s2, %s595_s29 }
  0x4e   : > { %615 = vmatprep.subr.mxu0 %v820_v0  ;;  %v289_v7 = vld [vmem:[%s284_s7] sm:$0xff]  ;;  %s479_s29 = scalar_lea.hbm %s1030_s5, %s601_s27  ;;  %s468_s24 = scalar_lea.sflag [#allocation4], %s961_s9 }
  0x4f   : > { %616 = vmatpush3.msra.mxu0 %v293_v4  ;;  %v291_v9 = vld [vmem:[%s288_s17] sm:$0xff]  ;;  %s746_s6 = scalar_lea.vmem %s482_s11, 128  ;;  %p1046_p11 = scmp.ne.s32.totalorder %s1040_s14, 0 }
  0x50   : > { %617 = vmatprep.subr.mxu0 %v820_v0  ;;  %p747_p3 = scmp.ne.s32.totalorder %s482_s11, %s746_s6  ;;  %s823_s7 = smov [#allocation7]  }
  0x51   : > { %618 = vmatpush3.msra.mxu0 %v292_v6  ;;  %s750_s8 = sshll.u32 %s823_s7, 4  ;;  %s751_s8 = int_to_ptr.vmem [resolvable:$false] %s750_s8 }
  0x52   : > { %620 = vmatmul.mubr.msk.f32.vlgmr.msra.gmra.mxu0 %vm303_vm2, %v289_v7  ;;  %p748_p7 = pnand %p747_p3, %p1046_p11  ;;  %s752_s22 = scalar_lea.vmem %s751_s8, 256 }
  0x53   : > { %p753_p2 = scmp.lt.s32.totalorder %s482_s11, %s751_s8  ;;  %p754_p13 = scmp.lt.s32.totalorder %s752_s22, %s746_s6 }
  0x54   : > { %p749_p10 = pneg %p748_p7 }
  0x55   : > { %p755_p0 = por %p754_p13, %p753_p2 }
  0x57   : > { %p756_p5 = pnand %p755_p0, %p749_p10 }
  0xd4   : > { %v380_v10 = vpop.xlane.xlu0 %379 }
  0xd5   : > { %v455_v11 = vadd.f32 %v380_v10, %v291_v9 }
  0xd7   : > { %vm456_vm3 = vcmp.eq.f32.partialorder %v455_v11, 0.0 }
  0xd8   : > { %v457_v12 = vsel %vm456_vm3, 1.0, %v455_v11 }
  0xd9   : > { %690 = vrcp.f32 %v457_v12 }
  0xe6   : > { %v691_v13 = vpop.eup %690 }
  0xe7   : > { %461 = vperm.xlu0 %689, %v691_v13  }
 0x112   : > { %v373_v15 = vpop.f32.mrf.mxu0 }
 0x113   : > { %v374_v16 = vadd.f32 %v597_v14, %v373_v15 }
 0x114   : > { %v621_v17 = vpop.f32.mrf.mxu0 }
 0x115   : > { %623 = vmatpush3.msra.mxu1 %v374_v16  ;;  %v381_v18 = vmul.f32 %v380_v10, %v374_v16 }
 0x116   : > { %625 = vmatmul.mubr.msk.f32.vlgmr.msra.gmra.mxu1 %vm377_vm1, %v290_v3 }
 0x162   : > { %v462_v20 = vpop.permute.xlu0 %461 }
 0x1d6   : > { %v451_v19 = vpop.f32.mrf.mxu1 }
 0x1d7   : > { %v452_v21 = vadd.f32 %v451_v19, %v381_v18 }
 0x1d8   : > { %v626_v22 = vpop.f32.mrf.mxu1 }
 0x1d9   : > { %v464_v23 = vmul.f32 %v462_v20, %v452_v21 }
 0x1db   : > { %v465_v24 = vmax.f32 %v464_v23, 0.0 }
 0x1dd   : > { %466 = vst [vmem:[%s280_s28] sm:$0xff] %v465_v24 }
 0x1de   : > { %759 = shalt.err (!%p756_p5)
}
 0x1df   : > { %s760_s10 = scalar_lea.hbm %s479_s29, 128  ;;  %s764_s17 = scalar_lea.hbm %s1030_s5, 256 }
 0x1e0   : > { %p761_p9 = scmp.ne.s32.totalorder %s479_s29, %s760_s10  ;;  %p765_p4 = scmp.lt.s32.totalorder %s479_s29, %s1030_s5 }
 0x1e1   : > { %p766_p6 = scmp.lt.s32.totalorder %s764_s17, %s760_s10 }
 0x1e2   : > { %p762_p12 = pnand %p761_p9, %p1046_p11 }
 0x1e3   : > { %p767_p8 = por %p766_p6, %p765_p4 }
 0x1e4   : > { %p763_p1 = pneg %p762_p12 }
 0x1e6   : > { %p768_p3 = pnand %p767_p8, %p763_p1 }
 0x1e8   : > { %771 = shalt.err (!%p768_p3)
}
 0x1e9   : > { %633 = dma.vmem_to_hbm [thread:$0]  (%p1046_p11), %s482_s11, 128, %s479_s29, %s468_s24  }
 0x1ea PF: > { %s493_s27 = sand.u32 1, %s802_s18   ;;  %p1047_p7 = scmp.ne.s32.totalorder %s1036_s25, 0 }
 0x1eb   : > { %p1048_p10 = scmp.ge.s32.totalorder %s814_s21, 2  ;;  %s494_s28 = scalar_lea.sflag [#allocation4], %s493_s27 }
 0x1ed   : > { %p644_p2 = pnand %p1048_p10, %p1047_p7 }
 0x1ef   : > { %p645_p13 = pneg %p644_p2 }
 0x1f1   : > { %797 = dma.done.wait (%p645_p13), %s494_s28, 128  }
 0x1f2   : > { %799 = vsyncadd (%p645_p13), %s494_s28, 4294967168  ;;  %p19_p0 = scmp.ge.s32.totalorder %s908_s30, 4   ;;  %s1049_s18 = smov %s806_s19 }
 0x1f3   : > { %s1050_s19 = smov %s810_s20  ;;  %s1051_s20 = smov %s925_s13 }
 0x1f4   : > { %s1052_s21 = smov %s908_s30  ;;  %21 = sbr.rel (!%p19_p0) target bundleno = 6 (0x6), region = 95 }
 0x1f9   :  { %499 = vsyncpa [#allocation3], 1 }
 0x1fa   :  { %501 = vsyncpa [#allocation3 + $0x1], 1 }
 0x1fb   :  { %502 = vsyncpa [#allocation6], 1 }
 0x1fc   :  { %503 = vsyncpa [#allocation4], 1 }
 0x1fd   :  { %505 = vsyncpa [#allocation4 + $0x1], 1 }

</bundles_post_ra>
